<compile_context>
chip_gen: v6e
topology: v6e:2x2x1
jax: 0.10.0
libtpu: 0.0.40
codegen_flags: <defaults>
</compile_context>

<pallas_src>
import functools

import jax
import jax.numpy as jnp
from jax.experimental import pallas as pl
from jax.experimental.pallas import tpu as pltpu


def _lstm_seq_kernel(x_ref, wih_ref, whh_ref, b_ref, h0_ref, c0_ref,
                     y_ref, hn_ref, cn_ref,
                     gx_ref, *, seq_len, hidden_size, unroll):
    """Whole-sequence LSTM in a single kernel invocation.

    x_ref  : (T*B, E)   flattened inputs (VMEM resident)
    wih_ref: (E, 4H)    W_ih^T
    whh_ref: (H, 4H)    W_hh^T
    b_ref  : (1, 4H)    b_ih + b_hh
    h0_ref : (B, H)     initial hidden state
    c0_ref : (B, H)     initial cell state
    y_ref  : (T, B, H)  per-step outputs (written back to HBM once at kernel end)
    hn_ref : (B, H)     final hidden state
    cn_ref : (B, H)     final cell state
    gx_ref : (T, B, 4H) VMEM scratch holding the hoisted input projection
    """
    T, H = seq_len, hidden_size
    B = h0_ref.shape[0]

    # ---- Phase 1 (non-recurrent): hoisted input projection + bias, one MXU matmul.
    gx = jnp.dot(x_ref[...], wih_ref[...], preferred_element_type=jnp.float32)
    gx = gx + b_ref[...]                          # (T*B, 4H)
    # Leading-axis-only split -> layout trivial (last dim stays 4H lanes).
    gx_ref[...] = gx.reshape(T, B, 4 * H)

    # ---- Phase 2 (recurrent): per step only the (B,H)x(H,4H) matmul + gates.
    def step(t, carry):
        h, c = carry                                              # (B, H) f32 in vregs
        gates = gx_ref[t] + jnp.dot(h, whh_ref[...],
                                    preferred_element_type=jnp.float32)   # (B, 4H)
        i_g = jax.nn.sigmoid(gates[:, 0 * H:1 * H])
        f_g = jax.nn.sigmoid(gates[:, 1 * H:2 * H])
        g_g = jnp.tanh(gates[:, 2 * H:3 * H])
        o_g = jax.nn.sigmoid(gates[:, 3 * H:4 * H])
        c_new = f_g * c + i_g * g_g
        h_new = o_g * jnp.tanh(c_new)
        y_ref[t] = h_new.astype(y_ref.dtype)      # VMEM store; bulk HBM writeback at end
        return (h_new, c_new)

    h0 = h0_ref[...].astype(jnp.float32)
    c0 = c0_ref[...].astype(jnp.float32)
    h_n, c_n = jax.lax.fori_loop(0, T, step, (h0, c0), unroll=unroll)

    hn_ref[...] = h_n.astype(hn_ref.dtype)
    cn_ref[...] = c_n.astype(cn_ref.dtype)


def encoder_forward(x, params, hidden=None):
    """Pallas equivalent of Encoder.forward.

    x      : (T, B, E) float32
    params : dict with w_ih (4H, E), w_hh (4H, H), b_ih (4H,), b_hh (4H,)
    hidden : optional (h0, c0), each (1, B, H); defaults to zeros (PyTorch hidden=None).

    Returns (output, (h_n, c_n)) like torch.nn.LSTM.
    """
    T, B, E = x.shape
    H = params["w_hh"].shape[1]

    x = x.astype(jnp.float32)
    w_ih_t = jnp.transpose(params["w_ih"]).astype(jnp.float32)   # (E, 4H)
    w_hh_t = jnp.transpose(params["w_hh"]).astype(jnp.float32)   # (H, 4H)
    bias = (params["b_ih"] + params["b_hh"]).reshape(1, 4 * H).astype(jnp.float32)

    if hidden is None:
        h0 = jnp.zeros((B, H), jnp.float32)
        c0 = jnp.zeros((B, H), jnp.float32)
    else:
        h0 = hidden[0].reshape(B, H).astype(jnp.float32)
        c0 = hidden[1].reshape(B, H).astype(jnp.float32)

    if T == 0:  # degenerate empty sequence: final state == initial state
        return jnp.zeros((0, B, H), jnp.float32), (h0[None], c0[None])

    kernel = functools.partial(
        _lstm_seq_kernel,
        seq_len=T, hidden_size=H,
        unroll=True if T <= 32 else 8,   # short fixed loops: full unroll for LLO visibility
    )

    y, h_n, c_n = pl.pallas_call(
        kernel,
        out_shape=(
            jax.ShapeDtypeStruct((T, B, H), jnp.float32),
            jax.ShapeDtypeStruct((B, H), jnp.float32),
            jax.ShapeDtypeStruct((B, H), jnp.float32),
        ),
        scratch_shapes=[pltpu.VMEM((T, B, 4 * H), jnp.float32)],  # hoisted G_x
    )(x.reshape(T * B, E), w_ih_t, w_hh_t, bias, h0, c0)

    return y, (h_n[None], c_n[None])


def init_encoder_params(key, embedding_size, hidden_size):
    """Deterministic init mimicking torch.nn.LSTM: U(-1/sqrt(H), 1/sqrt(H))."""
    k1, k2, k3, k4 = jax.random.split(key, 4)
    bound = 1.0 / (hidden_size ** 0.5)
    return {
        "w_ih": jax.random.uniform(k1, (4 * hidden_size, embedding_size),
                                   jnp.float32, -bound, bound),
        "w_hh": jax.random.uniform(k2, (4 * hidden_size, hidden_size),
                                   jnp.float32, -bound, bound),
        "b_ih": jax.random.uniform(k3, (4 * hidden_size,), jnp.float32, -bound, bound),
        "b_hh": jax.random.uniform(k4, (4 * hidden_size,), jnp.float32, -bound, bound),
    }


def _lstm_reference(x, params, h0, c0):
    """Pure-JAX reference for validation."""
    H = params["w_hh"].shape[1]
    w_ih_t = params["w_ih"].T
    w_hh_t = params["w_hh"].T
    b = params["b_ih"] + params["b_hh"]

    def step(carry, x_t):
        h, c = carry
        g = x_t @ w_ih_t + h @ w_hh_t + b
        i = jax.nn.sigmoid(g[:, 0 * H:1 * H])
        f = jax.nn.sigmoid(g[:, 1 * H:2 * H])
        gg = jnp.tanh(g[:, 2 * H:3 * H])
        o = jax.nn.sigmoid(g[:, 3 * H:4 * H])
        c_new = f * c + i * gg
        h_new = o * jnp.tanh(c_new)
        return (h_new, c_new), h_new

    (h_n, c_n), ys = jax.lax.scan(step, (h0[0], c0[0]), x)
    return ys, (h_n[None], c_n[None])


if __name__ == "__main__":
    # Small shapes: seq=8, batch=4, embedding_size=32, hidden_size=32 (4H = 128 -> lane aligned).
    T, B, E, H = 8, 4, 32, 32

    key = jax.random.PRNGKey(0)
    k_param, k_x = jax.random.split(key)

    params = init_encoder_params(k_param, E, H)
    x = jax.random.normal(k_x, (T, B, E), jnp.float32)

    # hidden=None branch of Encoder.forward
    y, (h_n, c_n) = encoder_forward(x, params, hidden=None)
    jax.block_until_ready((y, h_n, c_n))

    # Validate against a pure-JAX reference.
    h0 = jnp.zeros((1, B, H), jnp.float32)
    c0 = jnp.zeros((1, B, H), jnp.float32)
    y_ref, (hn_ref, cn_ref) = _lstm_reference(x, params, h0, c0)

    assert y.shape == (T, B, H) and h_n.shape == (1, B, H) and c_n.shape == (1, B, H)
    assert jnp.allclose(y, y_ref, atol=1e-4, rtol=1e-4), "output mismatch"
    assert jnp.allclose(h_n, hn_ref, atol=1e-4, rtol=1e-4), "h_n mismatch"
    assert jnp.allclose(c_n, cn_ref, atol=1e-4, rtol=1e-4), "c_n mismatch"

    # hidden provided branch (Encoder.forward(x, hidden))
    kh, kc = jax.random.split(jax.random.PRNGKey(1))
    h0u = jax.random.uniform(kh, (1, B, H), jnp.float32)
    c0u = jax.random.uniform(kc, (1, B, H), jnp.float32)
    y2, (hn2, cn2) = encoder_forward(x, params, hidden=(h0u, c0u))
    jax.block_until_ready((y2, hn2, cn2))
    y2_ref, (hn2_ref, cn2_ref) = _lstm_reference(x, params, h0u, c0u)
    assert jnp.allclose(y2, y2_ref, atol=1e-4, rtol=1e-4), "output mismatch (given hidden)"
    assert jnp.allclose(hn2, hn2_ref, atol=1e-4, rtol=1e-4), "h_n mismatch (given hidden)"
    assert jnp.allclose(cn2, cn2_ref, atol=1e-4, rtol=1e-4), "c_n mismatch (given hidden)"

    print("KERNEL_OK")
</pallas_src>

<mosaic_0001>
module attributes {stable_mosaic.version = 11 : i64} {
  func.func @_lstm_seq_kernel(%arg0: memref<32x32xf32, #tpu.memory_space<vmem>>, %arg1: memref<32x128xf32, #tpu.memory_space<vmem>>, %arg2: memref<32x128xf32, #tpu.memory_space<vmem>>, %arg3: memref<1x128xf32, #tpu.memory_space<vmem>>, %arg4: memref<4x32xf32, #tpu.memory_space<vmem>>, %arg5: memref<4x32xf32, #tpu.memory_space<vmem>>, %arg6: memref<8x4x32xf32, #tpu.memory_space<vmem>>, %arg7: memref<4x32xf32, #tpu.memory_space<vmem>>, %arg8: memref<4x32xf32, #tpu.memory_space<vmem>>, %arg9: memref<8x4x128xf32, #tpu.memory_space<vmem>>) attributes {dimension_semantics = [], scalar_prefetch = 0 : i64, scratch_operands = 1 : i64, tpu.core_type = #tpu.core_type<tc>} {
    %c0 = arith.constant 0 : index
    %c0_0 = arith.constant 0 : index
    %0 = vector.load %arg0[%c0, %c0_0] : memref<32x32xf32, #tpu.memory_space<vmem>>, vector<32x32xf32>
    %c0_1 = arith.constant 0 : index
    %c0_2 = arith.constant 0 : index
    %1 = vector.load %arg1[%c0_1, %c0_2] : memref<32x128xf32, #tpu.memory_space<vmem>>, vector<32x128xf32>
    %cst = arith.constant dense<0.000000e+00> : vector<32x128xf32>
    %2 = tpu.matmul %0, %1, %cst {dimension_numbers = #tpu.dot_dimension_numbers<[1], [0], [0], [1], [0, 0, 1, 1], [], []>} : vector<32x32xf32>, vector<32x128xf32>, vector<32x128xf32> -> vector<32x128xf32>
    %c0_3 = arith.constant 0 : index
    %c0_4 = arith.constant 0 : index
    %3 = vector.load %arg3[%c0_3, %c0_4] : memref<1x128xf32, #tpu.memory_space<vmem>>, vector<1x128xf32>
    %4 = vector.broadcast %3 : vector<1x128xf32> to vector<32x128xf32>
    %5 = arith.addf %2, %4 : vector<32x128xf32>
    %6 = vector.shape_cast %5 : vector<32x128xf32> to vector<8x4x128xf32>
    %c0_5 = arith.constant 0 : index
    %c0_6 = arith.constant 0 : index
    %c0_7 = arith.constant 0 : index
    %7 = vector.load %arg9[%c0_5, %c0_6, %c0_7] : memref<8x4x128xf32, #tpu.memory_space<vmem>>, vector<8x4x128xf32>
    tpu.vector_store %arg9[%c0_5, %c0_6, %c0_7], %6 {strides = array<i32>} : memref<8x4x128xf32, #tpu.memory_space<vmem>>, vector<8x4x128xf32>,
    %c0_8 = arith.constant 0 : index
    %c0_9 = arith.constant 0 : index
    %8 = vector.load %arg4[%c0_8, %c0_9] : memref<4x32xf32, #tpu.memory_space<vmem>>, vector<4x32xf32>
    %c0_10 = arith.constant 0 : index
    %c0_11 = arith.constant 0 : index
    %9 = vector.load %arg5[%c0_10, %c0_11] : memref<4x32xf32, #tpu.memory_space<vmem>>, vector<4x32xf32>
    %c0_i32 = arith.constant 0 : i32
    %10 = arith.index_cast %c0_i32 : i32 to index
    %c0_12 = arith.constant 0 : index
    %c0_13 = arith.constant 0 : index
    %11 = vector.load %arg9[%10, %c0_12, %c0_13] : memref<8x4x128xf32, #tpu.memory_space<vmem>>, vector<1x4x128xf32>
    %12 = vector.shape_cast %11 : vector<1x4x128xf32> to vector<4x128xf32>
    %c0_14 = arith.constant 0 : index
    %c0_15 = arith.constant 0 : index
    %13 = vector.load %arg2[%c0_14, %c0_15] : memref<32x128xf32, #tpu.memory_space<vmem>>, vector<32x128xf32>
    %cst_16 = arith.constant dense<0.000000e+00> : vector<4x128xf32>
    %14 = tpu.matmul %8, %13, %cst_16 {dimension_numbers = #tpu.dot_dimension_numbers<[1], [0], [0], [1], [0, 0, 1, 1], [], []>} : vector<4x32xf32>, vector<32x128xf32>, vector<4x128xf32> -> vector<4x128xf32>
    %15 = arith.addf %12, %14 : vector<4x128xf32>
    %16 = vector.extract_strided_slice %15 {offsets = [0, 0], sizes = [4, 32], strides = [1, 1]} : vector<4x128xf32> to vector<4x32xf32>
    %17 = arith.negf %16 : vector<4x32xf32>
    %18 = math.exp %17 : vector<4x32xf32>
    %cst_17 = arith.constant 1.000000e+00 : f32
    %19 = vector.broadcast %cst_17 : f32 to vector<4x32xf32>
    %20 = arith.addf %19, %18 : vector<4x32xf32>
    %21 = arith.divf %19, %20 : vector<4x32xf32>
    %22 = vector.extract_strided_slice %15 {offsets = [0, 32], sizes = [4, 32], strides = [1, 1]} : vector<4x128xf32> to vector<4x32xf32>
    %23 = arith.negf %22 : vector<4x32xf32>
    %24 = math.exp %23 : vector<4x32xf32>
    %cst_18 = arith.constant 1.000000e+00 : f32
    %25 = vector.broadcast %cst_18 : f32 to vector<4x32xf32>
    %26 = arith.addf %25, %24 : vector<4x32xf32>
    %27 = arith.divf %25, %26 : vector<4x32xf32>
    %28 = vector.extract_strided_slice %15 {offsets = [0, 64], sizes = [4, 32], strides = [1, 1]} : vector<4x128xf32> to vector<4x32xf32>
    %29 = math.tanh %28 : vector<4x32xf32>
    %30 = vector.extract_strided_slice %15 {offsets = [0, 96], sizes = [4, 32], strides = [1, 1]} : vector<4x128xf32> to vector<4x32xf32>
    %31 = arith.negf %30 : vector<4x32xf32>
    %32 = math.exp %31 : vector<4x32xf32>
    %cst_19 = arith.constant 1.000000e+00 : f32
    %33 = vector.broadcast %cst_19 : f32 to vector<4x32xf32>
    %34 = arith.addf %33, %32 : vector<4x32xf32>
    %35 = arith.divf %33, %34 : vector<4x32xf32>
    %36 = arith.mulf %27, %9 : vector<4x32xf32>
    %37 = arith.mulf %21, %29 : vector<4x32xf32>
    %38 = arith.addf %36, %37 : vector<4x32xf32>
    %39 = math.tanh %38 : vector<4x32xf32>
    %40 = arith.mulf %35, %39 : vector<4x32xf32>
    %41 = arith.index_cast %c0_i32 : i32 to index
    %c0_20 = arith.constant 0 : index
    %c0_21 = arith.constant 0 : index
    %42 = vector.load %arg6[%41, %c0_20, %c0_21] : memref<8x4x32xf32, #tpu.memory_space<vmem>>, vector<1x4x32xf32>
    %43 = vector.shape_cast %42 : vector<1x4x32xf32> to vector<4x32xf32>
    %44 = vector.shape_cast %40 : vector<4x32xf32> to vector<1x4x32xf32>
    tpu.vector_store %arg6[%41, %c0_20, %c0_21], %44 {strides = array<i32>} : memref<8x4x32xf32, #tpu.memory_space<vmem>>, vector<1x4x32xf32>,
    %c1_i32 = arith.constant 1 : i32
    %45 = arith.index_cast %c1_i32 : i32 to index
    %c0_22 = arith.constant 0 : index
    %c0_23 = arith.constant 0 : index
    %46 = vector.load %arg9[%45, %c0_22, %c0_23] : memref<8x4x128xf32, #tpu.memory_space<vmem>>, vector<1x4x128xf32>
    %47 = vector.shape_cast %46 : vector<1x4x128xf32> to vector<4x128xf32>
    %c0_24 = arith.constant 0 : index
    %c0_25 = arith.constant 0 : index
    %48 = vector.load %arg2[%c0_24, %c0_25] : memref<32x128xf32, #tpu.memory_space<vmem>>, vector<32x128xf32>
    %cst_26 = arith.constant dense<0.000000e+00> : vector<4x128xf32>
    %49 = tpu.matmul %40, %48, %cst_26 {dimension_numbers = #tpu.dot_dimension_numbers<[1], [0], [0], [1], [0, 0, 1, 1], [], []>} : vector<4x32xf32>, vector<32x128xf32>, vector<4x128xf32> -> vector<4x128xf32>
    %50 = arith.addf %47, %49 : vector<4x128xf32>
    %51 = vector.extract_strided_slice %50 {offsets = [0, 0], sizes = [4, 32], strides = [1, 1]} : vector<4x128xf32> to vector<4x32xf32>
    %52 = arith.negf %51 : vector<4x32xf32>
    %53 = math.exp %52 : vector<4x32xf32>
    %cst_27 = arith.constant 1.000000e+00 : f32
    %54 = vector.broadcast %cst_27 : f32 to vector<4x32xf32>
    %55 = arith.addf %54, %53 : vector<4x32xf32>
    %56 = arith.divf %54, %55 : vector<4x32xf32>
    %57 = vector.extract_strided_slice %50 {offsets = [0, 32], sizes = [4, 32], strides = [1, 1]} : vector<4x128xf32> to vector<4x32xf32>
    %58 = arith.negf %57 : vector<4x32xf32>
    %59 = math.exp %58 : vector<4x32xf32>
    %cst_28 = arith.constant 1.000000e+00 : f32
    %60 = vector.broadcast %cst_28 : f32 to vector<4x32xf32>
    %61 = arith.addf %60, %59 : vector<4x32xf32>
    %62 = arith.divf %60, %61 : vector<4x32xf32>
    %63 = vector.extract_strided_slice %50 {offsets = [0, 64], sizes = [4, 32], strides = [1, 1]} : vector<4x128xf32> to vector<4x32xf32>
    %64 = math.tanh %63 : vector<4x32xf32>
    %65 = vector.extract_strided_slice %50 {offsets = [0, 96], sizes = [4, 32], strides = [1, 1]} : vector<4x128xf32> to vector<4x32xf32>
    %66 = arith.negf %65 : vector<4x32xf32>
    %67 = math.exp %66 : vector<4x32xf32>
    %cst_29 = arith.constant 1.000000e+00 : f32
    %68 = vector.broadcast %cst_29 : f32 to vector<4x32xf32>
    %69 = arith.addf %68, %67 : vector<4x32xf32>
    %70 = arith.divf %68, %69 : vector<4x32xf32>
    %71 = arith.mulf %62, %38 : vector<4x32xf32>
    %72 = arith.mulf %56, %64 : vector<4x32xf32>
    %73 = arith.addf %71, %72 : vector<4x32xf32>
    %74 = math.tanh %73 : vector<4x32xf32>
    %75 = arith.mulf %70, %74 : vector<4x32xf32>
    %76 = arith.index_cast %c1_i32 : i32 to index
    %c0_30 = arith.constant 0 : index
    %c0_31 = arith.constant 0 : index
    %77 = vector.load %arg6[%76, %c0_30, %c0_31] : memref<8x4x32xf32, #tpu.memory_space<vmem>>, vector<1x4x32xf32>
    %78 = vector.shape_cast %77 : vector<1x4x32xf32> to vector<4x32xf32>
    %79 = vector.shape_cast %75 : vector<4x32xf32> to vector<1x4x32xf32>
    tpu.vector_store %arg6[%76, %c0_30, %c0_31], %79 {strides = array<i32>} : memref<8x4x32xf32, #tpu.memory_space<vmem>>, vector<1x4x32xf32>,
    %c2_i32 = arith.constant 2 : i32
    %80 = arith.index_cast %c2_i32 : i32 to index
    %c0_32 = arith.constant 0 : index
    %c0_33 = arith.constant 0 : index
    %81 = vector.load %arg9[%80, %c0_32, %c0_33] : memref<8x4x128xf32, #tpu.memory_space<vmem>>, vector<1x4x128xf32>
    %82 = vector.shape_cast %81 : vector<1x4x128xf32> to vector<4x128xf32>
    %c0_34 = arith.constant 0 : index
    %c0_35 = arith.constant 0 : index
    %83 = vector.load %arg2[%c0_34, %c0_35] : memref<32x128xf32, #tpu.memory_space<vmem>>, vector<32x128xf32>
    %cst_36 = arith.constant dense<0.000000e+00> : vector<4x128xf32>
    %84 = tpu.matmul %75, %83, %cst_36 {dimension_numbers = #tpu.dot_dimension_numbers<[1], [0], [0], [1], [0, 0, 1, 1], [], []>} : vector<4x32xf32>, vector<32x128xf32>, vector<4x128xf32> -> vector<4x128xf32>
    %85 = arith.addf %82, %84 : vector<4x128xf32>
    %86 = vector.extract_strided_slice %85 {offsets = [0, 0], sizes = [4, 32], strides = [1, 1]} : vector<4x128xf32> to vector<4x32xf32>
    %87 = arith.negf %86 : vector<4x32xf32>
    %88 = math.exp %87 : vector<4x32xf32>
    %cst_37 = arith.constant 1.000000e+00 : f32
    %89 = vector.broadcast %cst_37 : f32 to vector<4x32xf32>
    %90 = arith.addf %89, %88 : vector<4x32xf32>
    %91 = arith.divf %89, %90 : vector<4x32xf32>
    %92 = vector.extract_strided_slice %85 {offsets = [0, 32], sizes = [4, 32], strides = [1, 1]} : vector<4x128xf32> to vector<4x32xf32>
    %93 = arith.negf %92 : vector<4x32xf32>
    %94 = math.exp %93 : vector<4x32xf32>
    %cst_38 = arith.constant 1.000000e+00 : f32
    %95 = vector.broadcast %cst_38 : f32 to vector<4x32xf32>
    %96 = arith.addf %95, %94 : vector<4x32xf32>
    %97 = arith.divf %95, %96 : vector<4x32xf32>
    %98 = vector.extract_strided_slice %85 {offsets = [0, 64], sizes = [4, 32], strides = [1, 1]} : vector<4x128xf32> to vector<4x32xf32>
    %99 = math.tanh %98 : vector<4x32xf32>
    %100 = vector.extract_strided_slice %85 {offsets = [0, 96], sizes = [4, 32], strides = [1, 1]} : vector<4x128xf32> to vector<4x32xf32>
    %101 = arith.negf %100 : vector<4x32xf32>
    %102 = math.exp %101 : vector<4x32xf32>
    %cst_39 = arith.constant 1.000000e+00 : f32
    %103 = vector.broadcast %cst_39 : f32 to vector<4x32xf32>
    %104 = arith.addf %103, %102 : vector<4x32xf32>
    %105 = arith.divf %103, %104 : vector<4x32xf32>
    %106 = arith.mulf %97, %73 : vector<4x32xf32>
    %107 = arith.mulf %91, %99 : vector<4x32xf32>
    %108 = arith.addf %106, %107 : vector<4x32xf32>
    %109 = math.tanh %108 : vector<4x32xf32>
    %110 = arith.mulf %105, %109 : vector<4x32xf32>
    %111 = arith.index_cast %c2_i32 : i32 to index
    %c0_40 = arith.constant 0 : index
    %c0_41 = arith.constant 0 : index
    %112 = vector.load %arg6[%111, %c0_40, %c0_41] : memref<8x4x32xf32, #tpu.memory_space<vmem>>, vector<1x4x32xf32>
    %113 = vector.shape_cast %112 : vector<1x4x32xf32> to vector<4x32xf32>
    %114 = vector.shape_cast %110 : vector<4x32xf32> to vector<1x4x32xf32>
    tpu.vector_store %arg6[%111, %c0_40, %c0_41], %114 {strides = array<i32>} : memref<8x4x32xf32, #tpu.memory_space<vmem>>, vector<1x4x32xf32>,
    %c3_i32 = arith.constant 3 : i32
    %115 = arith.index_cast %c3_i32 : i32 to index
    %c0_42 = arith.constant 0 : index
    %c0_43 = arith.constant 0 : index
    %116 = vector.load %arg9[%115, %c0_42, %c0_43] : memref<8x4x128xf32, #tpu.memory_space<vmem>>, vector<1x4x128xf32>
    %117 = vector.shape_cast %116 : vector<1x4x128xf32> to vector<4x128xf32>
    %c0_44 = arith.constant 0 : index
    %c0_45 = arith.constant 0 : index
    %118 = vector.load %arg2[%c0_44, %c0_45] : memref<32x128xf32, #tpu.memory_space<vmem>>, vector<32x128xf32>
    %cst_46 = arith.constant dense<0.000000e+00> : vector<4x128xf32>
    %119 = tpu.matmul %110, %118, %cst_46 {dimension_numbers = #tpu.dot_dimension_numbers<[1], [0], [0], [1], [0, 0, 1, 1], [], []>} : vector<4x32xf32>, vector<32x128xf32>, vector<4x128xf32> -> vector<4x128xf32>
    %120 = arith.addf %117, %119 : vector<4x128xf32>
    %121 = vector.extract_strided_slice %120 {offsets = [0, 0], sizes = [4, 32], strides = [1, 1]} : vector<4x128xf32> to vector<4x32xf32>
    %122 = arith.negf %121 : vector<4x32xf32>
    %123 = math.exp %122 : vector<4x32xf32>
    %cst_47 = arith.constant 1.000000e+00 : f32
    %124 = vector.broadcast %cst_47 : f32 to vector<4x32xf32>
    %125 = arith.addf %124, %123 : vector<4x32xf32>
    %126 = arith.divf %124, %125 : vector<4x32xf32>
    %127 = vector.extract_strided_slice %120 {offsets = [0, 32], sizes = [4, 32], strides = [1, 1]} : vector<4x128xf32> to vector<4x32xf32>
    %128 = arith.negf %127 : vector<4x32xf32>
    %129 = math.exp %128 : vector<4x32xf32>
    %cst_48 = arith.constant 1.000000e+00 : f32
    %130 = vector.broadcast %cst_48 : f32 to vector<4x32xf32>
    %131 = arith.addf %130, %129 : vector<4x32xf32>
    %132 = arith.divf %130, %131 : vector<4x32xf32>
    %133 = vector.extract_strided_slice %120 {offsets = [0, 64], sizes = [4, 32], strides = [1, 1]} : vector<4x128xf32> to vector<4x32xf32>
    %134 = math.tanh %133 : vector<4x32xf32>
    %135 = vector.extract_strided_slice %120 {offsets = [0, 96], sizes = [4, 32], strides = [1, 1]} : vector<4x128xf32> to vector<4x32xf32>
    %136 = arith.negf %135 : vector<4x32xf32>
    %137 = math.exp %136 : vector<4x32xf32>
    %cst_49 = arith.constant 1.000000e+00 : f32
    %138 = vector.broadcast %cst_49 : f32 to vector<4x32xf32>
    %139 = arith.addf %138, %137 : vector<4x32xf32>
    %140 = arith.divf %138, %139 : vector<4x32xf32>
    %141 = arith.mulf %132, %108 : vector<4x32xf32>
    %142 = arith.mulf %126, %134 : vector<4x32xf32>
    %143 = arith.addf %141, %142 : vector<4x32xf32>
    %144 = math.tanh %143 : vector<4x32xf32>
    %145 = arith.mulf %140, %144 : vector<4x32xf32>
    %146 = arith.index_cast %c3_i32 : i32 to index
    %c0_50 = arith.constant 0 : index
    %c0_51 = arith.constant 0 : index
    %147 = vector.load %arg6[%146, %c0_50, %c0_51] : memref<8x4x32xf32, #tpu.memory_space<vmem>>, vector<1x4x32xf32>
    %148 = vector.shape_cast %147 : vector<1x4x32xf32> to vector<4x32xf32>
    %149 = vector.shape_cast %145 : vector<4x32xf32> to vector<1x4x32xf32>
    tpu.vector_store %arg6[%146, %c0_50, %c0_51], %149 {strides = array<i32>} : memref<8x4x32xf32, #tpu.memory_space<vmem>>, vector<1x4x32xf32>,
    %c4_i32 = arith.constant 4 : i32
    %150 = arith.index_cast %c4_i32 : i32 to index
    %c0_52 = arith.constant 0 : index
    %c0_53 = arith.constant 0 : index
    %151 = vector.load %arg9[%150, %c0_52, %c0_53] : memref<8x4x128xf32, #tpu.memory_space<vmem>>, vector<1x4x128xf32>
    %152 = vector.shape_cast %151 : vector<1x4x128xf32> to vector<4x128xf32>
    %c0_54 = arith.constant 0 : index
    %c0_55 = arith.constant 0 : index
    %153 = vector.load %arg2[%c0_54, %c0_55] : memref<32x128xf32, #tpu.memory_space<vmem>>, vector<32x128xf32>
    %cst_56 = arith.constant dense<0.000000e+00> : vector<4x128xf32>
    %154 = tpu.matmul %145, %153, %cst_56 {dimension_numbers = #tpu.dot_dimension_numbers<[1], [0], [0], [1], [0, 0, 1, 1], [], []>} : vector<4x32xf32>, vector<32x128xf32>, vector<4x128xf32> -> vector<4x128xf32>
    %155 = arith.addf %152, %154 : vector<4x128xf32>
    %156 = vector.extract_strided_slice %155 {offsets = [0, 0], sizes = [4, 32], strides = [1, 1]} : vector<4x128xf32> to vector<4x32xf32>
    %157 = arith.negf %156 : vector<4x32xf32>
    %158 = math.exp %157 : vector<4x32xf32>
    %cst_57 = arith.constant 1.000000e+00 : f32
    %159 = vector.broadcast %cst_57 : f32 to vector<4x32xf32>
    %160 = arith.addf %159, %158 : vector<4x32xf32>
    %161 = arith.divf %159, %160 : vector<4x32xf32>
    %162 = vector.extract_strided_slice %155 {offsets = [0, 32], sizes = [4, 32], strides = [1, 1]} : vector<4x128xf32> to vector<4x32xf32>
    %163 = arith.negf %162 : vector<4x32xf32>
    %164 = math.exp %163 : vector<4x32xf32>
    %cst_58 = arith.constant 1.000000e+00 : f32
    %165 = vector.broadcast %cst_58 : f32 to vector<4x32xf32>
    %166 = arith.addf %165, %164 : vector<4x32xf32>
    %167 = arith.divf %165, %166 : vector<4x32xf32>
    %168 = vector.extract_strided_slice %155 {offsets = [0, 64], sizes = [4, 32], strides = [1, 1]} : vector<4x128xf32> to vector<4x32xf32>
    %169 = math.tanh %168 : vector<4x32xf32>
    %170 = vector.extract_strided_slice %155 {offsets = [0, 96], sizes = [4, 32], strides = [1, 1]} : vector<4x128xf32> to vector<4x32xf32>
    %171 = arith.negf %170 : vector<4x32xf32>
    %172 = math.exp %171 : vector<4x32xf32>
    %cst_59 = arith.constant 1.000000e+00 : f32
    %173 = vector.broadcast %cst_59 : f32 to vector<4x32xf32>
    %174 = arith.addf %173, %172 : vector<4x32xf32>
    %175 = arith.divf %173, %174 : vector<4x32xf32>
    %176 = arith.mulf %167, %143 : vector<4x32xf32>
    %177 = arith.mulf %161, %169 : vector<4x32xf32>
    %178 = arith.addf %176, %177 : vector<4x32xf32>
    %179 = math.tanh %178 : vector<4x32xf32>
    %180 = arith.mulf %175, %179 : vector<4x32xf32>
    %181 = arith.index_cast %c4_i32 : i32 to index
    %c0_60 = arith.constant 0 : index
    %c0_61 = arith.constant 0 : index
    %182 = vector.load %arg6[%181, %c0_60, %c0_61] : memref<8x4x32xf32, #tpu.memory_space<vmem>>, vector<1x4x32xf32>
    %183 = vector.shape_cast %182 : vector<1x4x32xf32> to vector<4x32xf32>
    %184 = vector.shape_cast %180 : vector<4x32xf32> to vector<1x4x32xf32>
    tpu.vector_store %arg6[%181, %c0_60, %c0_61], %184 {strides = array<i32>} : memref<8x4x32xf32, #tpu.memory_space<vmem>>, vector<1x4x32xf32>,
    %c5_i32 = arith.constant 5 : i32
    %185 = arith.index_cast %c5_i32 : i32 to index
    %c0_62 = arith.constant 0 : index
    %c0_63 = arith.constant 0 : index
    %186 = vector.load %arg9[%185, %c0_62, %c0_63] : memref<8x4x128xf32, #tpu.memory_space<vmem>>, vector<1x4x128xf32>
    %187 = vector.shape_cast %186 : vector<1x4x128xf32> to vector<4x128xf32>
    %c0_64 = arith.constant 0 : index
    %c0_65 = arith.constant 0 : index
    %188 = vector.load %arg2[%c0_64, %c0_65] : memref<32x128xf32, #tpu.memory_space<vmem>>, vector<32x128xf32>
    %cst_66 = arith.constant dense<0.000000e+00> : vector<4x128xf32>
    %189 = tpu.matmul %180, %188, %cst_66 {dimension_numbers = #tpu.dot_dimension_numbers<[1], [0], [0], [1], [0, 0, 1, 1], [], []>} : vector<4x32xf32>, vector<32x128xf32>, vector<4x128xf32> -> vector<4x128xf32>
    %190 = arith.addf %187, %189 : vector<4x128xf32>
    %191 = vector.extract_strided_slice %190 {offsets = [0, 0], sizes = [4, 32], strides = [1, 1]} : vector<4x128xf32> to vector<4x32xf32>
    %192 = arith.negf %191 : vector<4x32xf32>
    %193 = math.exp %192 : vector<4x32xf32>
    %cst_67 = arith.constant 1.000000e+00 : f32
    %194 = vector.broadcast %cst_67 : f32 to vector<4x32xf32>
    %195 = arith.addf %194, %193 : vector<4x32xf32>
    %196 = arith.divf %194, %195 : vector<4x32xf32>
    %197 = vector.extract_strided_slice %190 {offsets = [0, 32], sizes = [4, 32], strides = [1, 1]} : vector<4x128xf32> to vector<4x32xf32>
    %198 = arith.negf %197 : vector<4x32xf32>
    %199 = math.exp %198 : vector<4x32xf32>
    %cst_68 = arith.constant 1.000000e+00 : f32
    %200 = vector.broadcast %cst_68 : f32 to vector<4x32xf32>
    %201 = arith.addf %200, %199 : vector<4x32xf32>
    %202 = arith.divf %200, %201 : vector<4x32xf32>
    %203 = vector.extract_strided_slice %190 {offsets = [0, 64], sizes = [4, 32], strides = [1, 1]} : vector<4x128xf32> to vector<4x32xf32>
    %204 = math.tanh %203 : vector<4x32xf32>
    %205 = vector.extract_strided_slice %190 {offsets = [0, 96], sizes = [4, 32], strides = [1, 1]} : vector<4x128xf32> to vector<4x32xf32>
    %206 = arith.negf %205 : vector<4x32xf32>
    %207 = math.exp %206 : vector<4x32xf32>
    %cst_69 = arith.constant 1.000000e+00 : f32
    %208 = vector.broadcast %cst_69 : f32 to vector<4x32xf32>
    %209 = arith.addf %208, %207 : vector<4x32xf32>
    %210 = arith.divf %208, %209 : vector<4x32xf32>
    %211 = arith.mulf %202, %178 : vector<4x32xf32>
    %212 = arith.mulf %196, %204 : vector<4x32xf32>
    %213 = arith.addf %211, %212 : vector<4x32xf32>
    %214 = math.tanh %213 : vector<4x32xf32>
    %215 = arith.mulf %210, %214 : vector<4x32xf32>
    %216 = arith.index_cast %c5_i32 : i32 to index
    %c0_70 = arith.constant 0 : index
    %c0_71 = arith.constant 0 : index
    %217 = vector.load %arg6[%216, %c0_70, %c0_71] : memref<8x4x32xf32, #tpu.memory_space<vmem>>, vector<1x4x32xf32>
    %218 = vector.shape_cast %217 : vector<1x4x32xf32> to vector<4x32xf32>
    %219 = vector.shape_cast %215 : vector<4x32xf32> to vector<1x4x32xf32>
    tpu.vector_store %arg6[%216, %c0_70, %c0_71], %219 {strides = array<i32>} : memref<8x4x32xf32, #tpu.memory_space<vmem>>, vector<1x4x32xf32>,
    %c6_i32 = arith.constant 6 : i32
    %220 = arith.index_cast %c6_i32 : i32 to index
    %c0_72 = arith.constant 0 : index
    %c0_73 = arith.constant 0 : index
    %221 = vector.load %arg9[%220, %c0_72, %c0_73] : memref<8x4x128xf32, #tpu.memory_space<vmem>>, vector<1x4x128xf32>
    %222 = vector.shape_cast %221 : vector<1x4x128xf32> to vector<4x128xf32>
    %c0_74 = arith.constant 0 : index
    %c0_75 = arith.constant 0 : index
    %223 = vector.load %arg2[%c0_74, %c0_75] : memref<32x128xf32, #tpu.memory_space<vmem>>, vector<32x128xf32>
    %cst_76 = arith.constant dense<0.000000e+00> : vector<4x128xf32>
    %224 = tpu.matmul %215, %223, %cst_76 {dimension_numbers = #tpu.dot_dimension_numbers<[1], [0], [0], [1], [0, 0, 1, 1], [], []>} : vector<4x32xf32>, vector<32x128xf32>, vector<4x128xf32> -> vector<4x128xf32>
    %225 = arith.addf %222, %224 : vector<4x128xf32>
    %226 = vector.extract_strided_slice %225 {offsets = [0, 0], sizes = [4, 32], strides = [1, 1]} : vector<4x128xf32> to vector<4x32xf32>
    %227 = arith.negf %226 : vector<4x32xf32>
    %228 = math.exp %227 : vector<4x32xf32>
    %cst_77 = arith.constant 1.000000e+00 : f32
    %229 = vector.broadcast %cst_77 : f32 to vector<4x32xf32>
    %230 = arith.addf %229, %228 : vector<4x32xf32>
    %231 = arith.divf %229, %230 : vector<4x32xf32>
    %232 = vector.extract_strided_slice %225 {offsets = [0, 32], sizes = [4, 32], strides = [1, 1]} : vector<4x128xf32> to vector<4x32xf32>
    %233 = arith.negf %232 : vector<4x32xf32>
    %234 = math.exp %233 : vector<4x32xf32>
    %cst_78 = arith.constant 1.000000e+00 : f32
    %235 = vector.broadcast %cst_78 : f32 to vector<4x32xf32>
    %236 = arith.addf %235, %234 : vector<4x32xf32>
    %237 = arith.divf %235, %236 : vector<4x32xf32>
    %238 = vector.extract_strided_slice %225 {offsets = [0, 64], sizes = [4, 32], strides = [1, 1]} : vector<4x128xf32> to vector<4x32xf32>
    %239 = math.tanh %238 : vector<4x32xf32>
    %240 = vector.extract_strided_slice %225 {offsets = [0, 96], sizes = [4, 32], strides = [1, 1]} : vector<4x128xf32> to vector<4x32xf32>
    %241 = arith.negf %240 : vector<4x32xf32>
    %242 = math.exp %241 : vector<4x32xf32>
    %cst_79 = arith.constant 1.000000e+00 : f32
    %243 = vector.broadcast %cst_79 : f32 to vector<4x32xf32>
    %244 = arith.addf %243, %242 : vector<4x32xf32>
    %245 = arith.divf %243, %244 : vector<4x32xf32>
    %246 = arith.mulf %237, %213 : vector<4x32xf32>
    %247 = arith.mulf %231, %239 : vector<4x32xf32>
    %248 = arith.addf %246, %247 : vector<4x32xf32>
    %249 = math.tanh %248 : vector<4x32xf32>
    %250 = arith.mulf %245, %249 : vector<4x32xf32>
    %251 = arith.index_cast %c6_i32 : i32 to index
    %c0_80 = arith.constant 0 : index
    %c0_81 = arith.constant 0 : index
    %252 = vector.load %arg6[%251, %c0_80, %c0_81] : memref<8x4x32xf32, #tpu.memory_space<vmem>>, vector<1x4x32xf32>
    %253 = vector.shape_cast %252 : vector<1x4x32xf32> to vector<4x32xf32>
    %254 = vector.shape_cast %250 : vector<4x32xf32> to vector<1x4x32xf32>
    tpu.vector_store %arg6[%251, %c0_80, %c0_81], %254 {strides = array<i32>} : memref<8x4x32xf32, #tpu.memory_space<vmem>>, vector<1x4x32xf32>,
    %c7_i32 = arith.constant 7 : i32
    %255 = arith.index_cast %c7_i32 : i32 to index
    %c0_82 = arith.constant 0 : index
    %c0_83 = arith.constant 0 : index
    %256 = vector.load %arg9[%255, %c0_82, %c0_83] : memref<8x4x128xf32, #tpu.memory_space<vmem>>, vector<1x4x128xf32>
    %257 = vector.shape_cast %256 : vector<1x4x128xf32> to vector<4x128xf32>
    %c0_84 = arith.constant 0 : index
    %c0_85 = arith.constant 0 : index
    %258 = vector.load %arg2[%c0_84, %c0_85] : memref<32x128xf32, #tpu.memory_space<vmem>>, vector<32x128xf32>
    %cst_86 = arith.constant dense<0.000000e+00> : vector<4x128xf32>
    %259 = tpu.matmul %250, %258, %cst_86 {dimension_numbers = #tpu.dot_dimension_numbers<[1], [0], [0], [1], [0, 0, 1, 1], [], []>} : vector<4x32xf32>, vector<32x128xf32>, vector<4x128xf32> -> vector<4x128xf32>
    %260 = arith.addf %257, %259 : vector<4x128xf32>
    %261 = vector.extract_strided_slice %260 {offsets = [0, 0], sizes = [4, 32], strides = [1, 1]} : vector<4x128xf32> to vector<4x32xf32>
    %262 = arith.negf %261 : vector<4x32xf32>
    %263 = math.exp %262 : vector<4x32xf32>
    %cst_87 = arith.constant 1.000000e+00 : f32
    %264 = vector.broadcast %cst_87 : f32 to vector<4x32xf32>
    %265 = arith.addf %264, %263 : vector<4x32xf32>
    %266 = arith.divf %264, %265 : vector<4x32xf32>
    %267 = vector.extract_strided_slice %260 {offsets = [0, 32], sizes = [4, 32], strides = [1, 1]} : vector<4x128xf32> to vector<4x32xf32>
    %268 = arith.negf %267 : vector<4x32xf32>
    %269 = math.exp %268 : vector<4x32xf32>
    %cst_88 = arith.constant 1.000000e+00 : f32
    %270 = vector.broadcast %cst_88 : f32 to vector<4x32xf32>
    %271 = arith.addf %270, %269 : vector<4x32xf32>
    %272 = arith.divf %270, %271 : vector<4x32xf32>
    %273 = vector.extract_strided_slice %260 {offsets = [0, 64], sizes = [4, 32], strides = [1, 1]} : vector<4x128xf32> to vector<4x32xf32>
    %274 = math.tanh %273 : vector<4x32xf32>
    %275 = vector.extract_strided_slice %260 {offsets = [0, 96], sizes = [4, 32], strides = [1, 1]} : vector<4x128xf32> to vector<4x32xf32>
    %276 = arith.negf %275 : vector<4x32xf32>
    %277 = math.exp %276 : vector<4x32xf32>
    %cst_89 = arith.constant 1.000000e+00 : f32
    %278 = vector.broadcast %cst_89 : f32 to vector<4x32xf32>
    %279 = arith.addf %278, %277 : vector<4x32xf32>
    %280 = arith.divf %278, %279 : vector<4x32xf32>
    %281 = arith.mulf %272, %248 : vector<4x32xf32>
    %282 = arith.mulf %266, %274 : vector<4x32xf32>
    %283 = arith.addf %281, %282 : vector<4x32xf32>
    %284 = math.tanh %283 : vector<4x32xf32>
    %285 = arith.mulf %280, %284 : vector<4x32xf32>
    %286 = arith.index_cast %c7_i32 : i32 to index
    %c0_90 = arith.constant 0 : index
    %c0_91 = arith.constant 0 : index
    %287 = vector.load %arg6[%286, %c0_90, %c0_91] : memref<8x4x32xf32, #tpu.memory_space<vmem>>, vector<1x4x32xf32>
    %288 = vector.shape_cast %287 : vector<1x4x32xf32> to vector<4x32xf32>
    %289 = vector.shape_cast %285 : vector<4x32xf32> to vector<1x4x32xf32>
    tpu.vector_store %arg6[%286, %c0_90, %c0_91], %289 {strides = array<i32>} : memref<8x4x32xf32, #tpu.memory_space<vmem>>, vector<1x4x32xf32>,
    %c8_i32 = arith.constant 8 : i32
    %c0_92 = arith.constant 0 : index
    %c0_93 = arith.constant 0 : index
    %290 = vector.load %arg7[%c0_92, %c0_93] : memref<4x32xf32, #tpu.memory_space<vmem>>, vector<4x32xf32>
    tpu.vector_store %arg7[%c0_92, %c0_93], %285 {strides = array<i32>} : memref<4x32xf32, #tpu.memory_space<vmem>>, vector<4x32xf32>,
    %c0_94 = arith.constant 0 : index
    %c0_95 = arith.constant 0 : index
    %291 = vector.load %arg8[%c0_94, %c0_95] : memref<4x32xf32, #tpu.memory_space<vmem>>, vector<4x32xf32>
    tpu.vector_store %arg8[%c0_94, %c0_95], %283 {strides = array<i32>} : memref<4x32xf32, #tpu.memory_space<vmem>>, vector<4x32xf32>,
    return
  }
}

</mosaic_0001>

<bundles_post_ra>
// kernel: tpu_custom_call.1
= control target key start
LH: loop header
LB: loop body
LE: loop exit
PB: predicated region body
PF: predicated region fallthrough
CT: control target
= control target key end

     0   :  { %14 = vsyncpa [#allocation4], 0  ;;  %s1739_s0 = inlined_call_operand.hbm [shape: f32[32,32], index: 0, kind: input, shape index: {}]   ;;  %s1740_s1 = inlined_call_operand.hbm [shape: f32[32,128], index: 1, kind: input, shape index: {}]   ;;  %s1741_s2 = inlined_call_operand.hbm [shape: f32[32,128], index: 2, kind: input, shape index: {}]   ;;  %s1742_s3 = inlined_call_operand.vmem [shape: f32[1,128], index: 3, kind: input, shape index: {}]   ;;  %s1743_s4 = inlined_call_operand.vmem [shape: f32[4,32], index: 4, kind: input, shape index: {}]   ;;  %s1744_s5 = inlined_call_operand.vmem [shape: f32[4,32], index: 5, kind: input, shape index: {}]   ;;  %s1745_s6 = inlined_call_operand.hbm [shape: f32[8,4,32], index: 6, kind: output, shape index: {0}]   ;;  %s1746_s7 = inlined_call_operand.hbm [shape: f32[4,32], index: 7, kind: output, shape index: {1}]   ;;  %s1747_s8 = inlined_call_operand.hbm [shape: f32[4,32], index: 8, kind: output, shape index: {2}]  }
   0x1   :  { %15 = vsyncpa [#allocation7], 0 }
   0x2   :  { %16 = vsyncpa [#allocation5], 0 }
   0x3   :  { %17 = vsyncpa [#allocation11], 0  ;;  %s1508_s27 = smov [#allocation6]   ;;  %s1509_s29 = smov [#allocation3]  }
   0x4   :  { %s35_s28 = sshll.u32 %s1508_s27, 4  ;;  %s23_s30 = sshll.u32 %s1509_s29, 4  ;;  %s36_s28 = int_to_ptr.vmem [resolvable:$true] %s35_s28  ;;  %s24_s30 = int_to_ptr.vmem [resolvable:$true] %s23_s30 }
   0x5   :  { %s1388_s9 = scalar_lea.vmem %s36_s28, 512  ;;  %p1393_p1 = scmp.lt.s32.totalorder %s36_s28, %s36_s28 }
   0x6   :  { %p1389_p0 = scmp.ne.s32.totalorder %s36_s28, %s1388_s9  ;;  %p1394_p2 = scmp.lt.s32.totalorder %s1388_s9, %s1388_s9 }
   0x8   :  { %p1395_p3 = por %p1394_p2, %p1393_p1 }
   0xa   :  { %p1396_p4 = pnand %p1395_p3, %p1389_p0 }
   0xc   :  { %1399 = shalt.err (!%p1396_p4)
}
   0xd   :  { %s1510_s10 = smov 128   ;;  %s1511_s11 = smov 8  }
   0xe   :  { %41 = dma.hbm_to_vmem [thread:$0]  %s1740_s1, 512, %s36_s28, [#allocation7], %s1510_s10, %s1510_s10, %s1511_s11  }
   0xf   :  { %s1408_s14 = scalar_lea.vmem %s24_s30, 512  ;;  %p1413_p6 = scmp.lt.s32.totalorder %s24_s30, %s24_s30 }
  0x10   :  { %p1409_p5 = scmp.ne.s32.totalorder %s24_s30, %s1408_s14  ;;  %p1414_p7 = scmp.lt.s32.totalorder %s1408_s14, %s1408_s14 }
  0x12   :  { %p1415_p8 = por %p1414_p7, %p1413_p6 }
  0x14   :  { %p1416_p9 = pnand %p1415_p8, %p1409_p5 }
  0x16   :  { %1419 = shalt.err (!%p1416_p9)
}
  0x17   :  { %29 = dma.hbm_to_vmem [thread:$0]  %s1739_s0, 512, %s24_s30, [#allocation4], %s1510_s10, %s1510_s10, %s1511_s11  }
  0x18   :  { %s1512_s17 = smov [#allocation8]  }
  0x19   :  { %s47_s18 = sshll.u32 %s1512_s17, 4  ;;  %s48_s18 = int_to_ptr.vmem [resolvable:$true] %s47_s18 }
  0x1a   :  { %s1428_s19 = scalar_lea.vmem %s48_s18, 512  ;;  %p1433_p11 = scmp.lt.s32.totalorder %s48_s18, %s48_s18 }
  0x1b   :  { %p1429_p10 = scmp.ne.s32.totalorder %s48_s18, %s1428_s19  ;;  %p1434_p12 = scmp.lt.s32.totalorder %s1428_s19, %s1428_s19 }
  0x1d   :  { %p1435_p13 = por %p1434_p12, %p1433_p11 }
  0x1f   :  { %p1436_p0 = pnand %p1435_p13, %p1429_p10 }
  0x21   :  { %1439 = shalt.err (!%p1436_p0)
}
  0x22   :  { %53 = dma.hbm_to_vmem [thread:$0]  %s1741_s2, 512, %s48_s18, [#allocation7], %s1510_s10, %s1510_s10, %s1511_s11  }
  0x23   :  { %1500 = dma.done.wait [#allocation4], 512  }
  0x24   :  { %1501 = vsyncadd [#allocation4], 4294966784 }
  0x25   :  { %1502 = dma.done.wait [#allocation7], 1024  }
  0x26   :  { %1503 = vsyncadd [#allocation7], 4294966272  ;;  %v1513_v0 = vmov 0.0   ;;  %vm1514_vm0 = vmmov 0   ;;  %vm84_vm1 = vcmask 261120   ;;  %v76_v1 = vld [vmem:[#allocation6 + $0x18] sm:$0xff] }
  0x27   :  { %1214 = vmatprep.subr.mxu1 %v1513_v0  ;;  %1222 = vmatprep.mubr.msk.f32.mxu1 %vm1514_vm0, %v1513_v0  ;;  %v75_v2 = vld [vmem:[#allocation6 + $0x10] sm:$0xff]  ;;  %v69_v3 = vld [vmem:[#allocation3] sm:$0xff]  ;;  %v74_v4 = vld [vmem:[#allocation6 + $0x8] sm:$0xff]  ;;  %s1515_s22 = smov 64   ;;  %s1516_s24 = smov 32   ;;  %vm315_vm2 = vcmask 257024  }
  0x28   :  { %1200 = vmatprep.subr.mxu0 %v76_v1  ;;  %1208 = vmatprep.mubr.msk.f32.mxu0 %vm84_vm1, %v69_v3  ;;  %v1580_v5 = vld [vmem:[#allocation8 + $0x18] sm:$0xff]  ;;  %v1582_v6 = vld [vmem:[#allocation8 + $0x10] sm:$0xff]  ;;  %v73_v7 = vld [vmem:[#allocation6] sm:$0xff]  ;;  %s1518_s25 = smov [#allocation10]   ;;  %s1519_s27 = smov [#allocation9]  }
  0x29   :  { %1201 = vmatpush3.msra.mxu0 %v76_v1  ;;  %1215 = vmatpush3.msra.mxu1 %v1580_v5  ;;  %v1586_v8 = vld [vmem:[#allocation8 + $0x8] sm:$0xff]  ;;  %v1590_v10 = vld [vmem:[#allocation8] sm:$0xff]  ;;  %v71_v35 = vld [vmem:[#allocation3 + $0x10] sm:$0xff]  ;;  %s1104_s26 = sshll.u32 %s1518_s25, 4  ;;  %s1091_s28 = sshll.u32 %s1519_s27, 4  ;;  %s1105_s26 = int_to_ptr.vmem [resolvable:$true] %s1104_s26  ;;  %s1092_s28 = int_to_ptr.vmem [resolvable:$true] %s1091_s28 }
  0x2a   :  { %1202 = vmatprep.subr.mxu0 %v75_v2  ;;  %1216 = vmatprep.subr.mxu1 %v1513_v0  ;;  %v70_v9 = vld [vmem:[#allocation3 + $0x8] sm:$0xff]  ;;  %v202_v11 = vld [vmem:[%s1743_s4] sm:$0xf]  ;;  %v72_v36 = vld [vmem:[#allocation3 + $0x18] sm:$0xff]  ;;  %s1520_s29 = smov [#allocation12]   ;;  %s1440_s9 = scalar_lea.vmem %s1105_s26, 64 }
  0x2b   :  { %1203 = vmatpush3.msra.mxu0 %v75_v2  ;;  %1217 = vmatpush3.msra.mxu1 %v1582_v6  ;;  %v1131_v12 = vld [vmem:[%s1742_s3] ss:$0 sm:$0xff]  ;;  %s1114_s30 = sshll.u32 %s1520_s29, 4  ;;  %p1441_p1 = scmp.ne.s32.totalorder %s1105_s26, %s1440_s9  ;;  %s1115_s30 = int_to_ptr.vmem [resolvable:$true] %s1114_s30 }
  0x2c   :  { %1204 = vmatprep.subr.mxu0 %v74_v4  ;;  %1218 = vmatprep.subr.mxu1 %v1513_v0  ;;  %v203_v24 = vld [vmem:[%s1744_s5] sm:$0xf]  ;;  %s1517_s5 = smov 96   ;;  %p1445_p2 = scmp.lt.s32.totalorder %s1105_s26, %s1105_s26 }
  0x2d   :  { %1205 = vmatpush3.msra.mxu0 %v74_v4  ;;  %1219 = vmatpush3.msra.mxu1 %v1586_v8  ;;  %p1446_p3 = scmp.lt.s32.totalorder %s1440_s9, %s1440_s9 }
  0x2e   :  { %1206 = vmatprep.subr.mxu0 %v73_v7  ;;  %1220 = vmatprep.subr.mxu1 %v1513_v0 }
  0x2f   :  { %1207 = vmatpush3.msra.mxu0 %v73_v7  ;;  %1221 = vmatpush3.msra.mxu1 %v1590_v10  ;;  %p1447_p4 = por %p1446_p3, %p1445_p2 }
  0x30   :  { %1209 = vmatmul.mubr.msk.f32.vlgmr.msra.gmra.mxu0 %vm84_vm1, %v70_v9  ;;  %1223 = vmatmul.mubr.msk.f32.vlgmr.msra.gmra.mxu1 %vm84_vm1, %v202_v11 }
  0x31   :  { %1225 = vmatprep.subr.mxu0 %v1513_v0  ;;  %1236 = vmatprep.subr.mxu1 %v1513_v0  ;;  %p1448_p5 = pnand %p1447_p4, %p1441_p1 }
  0x32   :  { %1226 = vmatpush3.msra.mxu0 %v1580_v5  ;;  %1237 = vmatpush3.msra.mxu1 %v1580_v5 }
  0x33   :  { %1227 = vmatprep.subr.mxu0 %v1513_v0  ;;  %1238 = vmatprep.subr.mxu1 %v1513_v0 }
  0x34   :  { %1228 = vmatpush3.msra.mxu0 %v1582_v6  ;;  %1239 = vmatpush3.msra.mxu1 %v1582_v6 }
  0x35   :  { %1229 = vmatprep.subr.mxu0 %v1513_v0  ;;  %1240 = vmatprep.subr.mxu1 %v1513_v0 }
  0x36   :  { %1230 = vmatpush3.msra.mxu0 %v1586_v8  ;;  %1241 = vmatpush3.msra.mxu1 %v1586_v8 }
  0x37   :  { %1231 = vmatprep.subr.mxu0 %v1513_v0  ;;  %1242 = vmatprep.subr.mxu1 %v1513_v0 }
  0x38   :  { %1232 = vmatpush3.msra.mxu0 %v1590_v10  ;;  %1243 = vmatpush3.msra.mxu1 %v1590_v10 }
  0x39   :  { %1244 = vmatprep.mubr.msk.f32.mxu1 %vm1514_vm0, %v1513_v0  ;;  %1247 = vmatprep.subr.mxu0 %v1513_v0 }
  0x3a   :  { %1258 = vmatprep.subr.mxu1 %v1513_v0  ;;  %1211 = vmatprep.mubr.msk.f32.mxu0 %vm84_vm1, %v71_v35 }
  0x3b   :  { %1212 = vmatmul.mubr.msk.f32.gmra.mxu0 %vm84_vm1, %v72_v36 }
  0x3c   :  { %1233 = vmatprep.mubr.msk.f32.mxu0 %vm1514_vm0, %v1513_v0 }
  0xf0   :  { %v1210_v13 = vpop.f32.mrf.mxu0  ;;  %v278_v15 = vpop.f32.mrf.mxu1 }
  0xf1   :  { %v169_v14 = vadd.f32 %v1210_v13, %v1131_v12 }
  0xf2   :  { %v163_v16 = vpop.f32.mrf.mxu0  ;;  %v1224_v19 = vpop.f32.mrf.mxu1 }
  0xf3   :  { %v187_v17 = vcombine.high %v169_v14, %v169_v14  ;;  %196 = vst [vmem:[#allocation2 + $0x8] sm:$0xf] %v169_v14  ;;  %v164_v18 = vadd.f32 %v1131_v12, %v163_v16 }
  0xf5   :  { %197 = vst [vmem:[#allocation2 + $0xc] sm:$0xf] %v187_v17  ;;  %v186_v20 = vcombine.high %v164_v18, %v164_v18  ;;  %194 = vst [vmem:[#allocation2] sm:$0xf] %v164_v18 }
  0xf7   :  { %195 = vst [vmem:[#allocation2 + $0x4] sm:$0xf] %v186_v20 }
  0xfa   :  { %v427_v2 = vld [vmem:[#allocation2 + $0x8] sm:$0xf] }
  0xfb   :  { %v1213_v40 = vpop.f32.mrf.mxu0 }
  0xfc   :  { %v204_v21 = vld [vmem:[#allocation2] sm:$0xf]  ;;  %v179_v41 = vadd.f32 %v1213_v40, %v1131_v12 }
  0xfd   :  { %v282_v22 = vadd.f32 %v278_v15, %v204_v21  ;;  %v173_v42 = vpop.f32.mrf.mxu0 }
  0xfe   :  { %v189_v43 = vcombine.high %v179_v41, %v179_v41  ;;  %200 = vst [vmem:[#allocation2 + $0x18] sm:$0xf] %v179_v41  ;;  %v174_v44 = vadd.f32 %v1131_v12, %v173_v42  ;;  %v318_v47 = vld [vmem:[#allocation2 + $0x4] sm:$0xf] }
  0xff   :  { %1316 = vtanh.f32 %v282_v22  ;;  %v1137_v25 = vmul.f32 -1.442695, %v282_v22 }
 0x100   :  { %201 = vst [vmem:[#allocation2 + $0x1c] sm:$0xf] %v189_v43  ;;  %v188_v45 = vcombine.high %v174_v44, %v174_v44  ;;  %198 = vst [vmem:[#allocation2 + $0x10] sm:$0xf] %v174_v44 }
 0x101   :  { %1318 = vpow2.f32 %v1137_v25 }
 0x102   :  { %199 = vst [vmem:[#allocation2 + $0x14] sm:$0xf] %v188_v45 }
 0x107   :  { %v645_v42 = vld [vmem:[#allocation2 + $0x10] sm:$0xf] }
 0x10c   :  { %v1317_v23 = vpop.eup %1316 }
 0x10d   :  { %296 = vrot.lane.b32.xlu0 %v1317_v23, %s1515_s22 }
 0x10e   :  { %v1319_v26 = vpop.eup %1318 }
 0x10f   :  { %v286_v27 = vadd.f32 1.0, %v1319_v26 }
 0x111   :  { %291 = vrot.lane.b32.xlu0 %v203_v24, %s1516_s24  ;;  %1320 = vrcp.f32 %v286_v27  ;;  %v536_v24 = vld [vmem:[#allocation2 + $0xc] sm:$0xf] }
 0x11e   :  { %v1321_v28 = vpop.eup %1320 }
 0x17f   :  { %v297_v29 = vpop.permute.xlu0 %296 }
 0x180   :  { %v299_v30 = vmul.f32 %v1321_v28, %v297_v29 }
 0x182   :  { %301 = vrot.lane.b32.xlu1 %v299_v30, %s1516_s24 }
 0x183   :  { %v292_v31 = vpop.permute.xlu0 %291 }
 0x184   :  { %v294_v32 = vmul.f32 %v1321_v28, %v292_v31 }
 0x1f4   :  { %v302_v33 = vpop.permute.xlu1 %301 }
 0x1f5   :  { %v304_v34 = vadd.f32 %v302_v33, %v294_v32 }
 0x1f7   :  { %1322 = vtanh.f32 %v304_v34 }
 0x204   :  { %v1323_v37 = vpop.eup %1322 }
 0x205   :  { %307 = vrot.lane.b32.xlu1 %v1323_v37, %s1515_s22 }
 0x277   :  { %v308_v38 = vpop.permute.xlu1 %307 }
 0x278   :  { %v310_v39 = vmul.f32 %v1321_v28, %v308_v38 }
 0x27a   :  { %312 = vrot.lane.b32.xlu0 %v310_v39, %s1516_s24 }
 0x2ec   :  { %v313_v46 = vpop.permute.xlu0 %312 }
 0x2ed   :  { %316 = vst.msk [vmem:[#allocation9] sm:$0xf] %vm315_vm2, %v313_v46  ;;  %1234 = vmatmul.mubr.msk.f32.vlgmr.msra.gmra.mxu0 %vm84_vm1, %v313_v46 }
 0x2ee   :  { %1248 = vmatpush3.msra.mxu0 %v1580_v5  ;;  %1255 = vmatprep.mubr.msk.f32.mxu0 %vm1514_vm0, %v1513_v0 }
 0x2ef   :  { %1249 = vmatprep.subr.mxu0 %v1513_v0 }
 0x2f0   :  { %1250 = vmatpush3.msra.mxu0 %v1582_v6 }
 0x2f1   :  { %1251 = vmatprep.subr.mxu0 %v1513_v0 }
 0x2f2   :  { %1252 = vmatpush3.msra.mxu0 %v1586_v8 }
 0x2f3   :  { %1253 = vmatprep.subr.mxu0 %v1513_v0 }
 0x2f4   :  { %1254 = vmatpush3.msra.mxu0 %v1590_v10 }
 0x2f5   :  { %1269 = vmatprep.subr.mxu0 %v1513_v0 }
 0x3ad   :  { %v391_v48 = vpop.f32.mrf.mxu0 }
 0x3ae   :  { %v395_v49 = vadd.f32 %v391_v48, %v318_v47 }
 0x3af   :  { %v1235_v50 = vpop.f32.mrf.mxu0 }
 0x3b0   :  { %1324 = vtanh.f32 %v395_v49  ;;  %v1139_v52 = vmul.f32 -1.442695, %v395_v49 }
 0x3b2   :  { %1326 = vpow2.f32 %v1139_v52 }
 0x3bd   :  { %v1325_v51 = vpop.eup %1324 }
 0x3be   :  { %405 = vrot.lane.b32.xlu1 %v1325_v51, %s1515_s22 }
 0x3bf   :  { %v1327_v53 = vpop.eup %1326 }
 0x3c0   :  { %v399_v54 = vadd.f32 1.0, %v1327_v53 }
 0x3c2   :  { %1328 = vrcp.f32 %v399_v54 }
 0x3cf   :  { %v1329_v55 = vpop.eup %1328 }
 0x3d0   :  { %v403_v58 = vmul.f32 %v1329_v55, %v304_v34 }
 0x430   :  { %v406_v56 = vpop.permute.xlu1 %405 }
 0x431   :  { %v408_v57 = vmul.f32 %v1329_v55, %v406_v56 }
 0x433   :  { %410 = vrot.lane.b32.xlu0 %v408_v57, %s1516_s24 }
 0x4a5   :  { %v411_v59 = vpop.permute.xlu0 %410 }
 0x4a6   :  { %v413_v60 = vadd.f32 %v411_v59, %v403_v58 }
 0x4a8   :  { %1330 = vtanh.f32 %v413_v60 }
 0x4b5   :  { %v1331_v61 = vpop.eup %1330 }
 0x4b6   :  { %416 = vrot.lane.b32.xlu1 %v1331_v61, %s1515_s22 }
 0x528   :  { %v417_v62 = vpop.permute.xlu1 %416 }
 0x529   :  { %v419_v63 = vmul.f32 %v1329_v55, %v417_v62 }
 0x52b   :  { %421 = vrot.lane.b32.xlu0 %v419_v63, %s1516_s24 }
 0x59d   :  { %v422_v1 = vpop.permute.xlu0 %421 }
 0x59e   :  { %425 = vst.msk [vmem:[#allocation9 + $0x4] sm:$0xf] %vm315_vm2, %v422_v1  ;;  %1245 = vmatmul.mubr.msk.f32.vlgmr.msra.gmra.mxu1 %vm84_vm1, %v422_v1 }
 0x59f   :  { %1259 = vmatpush3.msra.mxu1 %v1580_v5  ;;  %1266 = vmatprep.mubr.msk.f32.mxu1 %vm1514_vm0, %v1513_v0 }
 0x5a0   :  { %1260 = vmatprep.subr.mxu1 %v1513_v0 }
 0x5a1   :  { %1261 = vmatpush3.msra.mxu1 %v1582_v6 }
 0x5a2   :  { %1262 = vmatprep.subr.mxu1 %v1513_v0 }
 0x5a3   :  { %1263 = vmatpush3.msra.mxu1 %v1586_v8 }
 0x5a4   :  { %1264 = vmatprep.subr.mxu1 %v1513_v0 }
 0x5a5   :  { %1265 = vmatpush3.msra.mxu1 %v1590_v10 }
 0x5a6   :  { %1280 = vmatprep.subr.mxu1 %v1513_v0 }
 0x65e   :  { %v500_v3 = vpop.f32.mrf.mxu1 }
 0x65f   :  { %v504_v4 = vadd.f32 %v500_v3, %v427_v2 }
 0x660   :  { %v1246_v7 = vpop.f32.mrf.mxu1 }
 0x661   :  { %1332 = vtanh.f32 %v504_v4  ;;  %v1141_v11 = vmul.f32 -1.442695, %v504_v4 }
 0x663   :  { %1334 = vpow2.f32 %v1141_v11 }
 0x66e   :  { %v1333_v9 = vpop.eup %1332 }
 0x66f   :  { %514 = vrot.lane.b32.xlu1 %v1333_v9, %s1515_s22 }
 0x670   :  { %v1335_v12 = vpop.eup %1334 }
 0x671   :  { %v508_v13 = vadd.f32 1.0, %v1335_v12 }
 0x673   :  { %1336 = vrcp.f32 %v508_v13 }
 0x680   :  { %v1337_v14 = vpop.eup %1336 }
 0x681   :  { %v512_v17 = vmul.f32 %v1337_v14, %v413_v60  ;;  %v754_v60 = vld [vmem:[#allocation2 + $0x14] sm:$0xf] }
 0x6e1   :  { %v515_v15 = vpop.permute.xlu1 %514 }
 0x6e2   :  { %v517_v16 = vmul.f32 %v1337_v14, %v515_v15 }
 0x6e4   :  { %519 = vrot.lane.b32.xlu0 %v517_v16, %s1516_s24 }
 0x756   :  { %v520_v18 = vpop.permute.xlu0 %519 }
 0x757   :  { %v522_v19 = vadd.f32 %v520_v18, %v512_v17 }
 0x759   :  { %1338 = vtanh.f32 %v522_v19 }
 0x766   :  { %v1339_v20 = vpop.eup %1338 }
 0x767   :  { %525 = vrot.lane.b32.xlu1 %v1339_v20, %s1515_s22 }
 0x7d9   :  { %v526_v21 = vpop.permute.xlu1 %525 }
 0x7da   :  { %v528_v22 = vmul.f32 %v1337_v14, %v526_v21  ;;  %v863_v14 = vld [vmem:[#allocation2 + $0x18] sm:$0xf] }
 0x7dc   :  { %530 = vrot.lane.b32.xlu0 %v528_v22, %s1516_s24 }
 0x84e   :  { %v531_v23 = vpop.permute.xlu0 %530 }
 0x84f   :  { %534 = vst.msk [vmem:[#allocation9 + $0x8] sm:$0xf] %vm315_vm2, %v531_v23  ;;  %1256 = vmatmul.mubr.msk.f32.vlgmr.msra.gmra.mxu0 %vm84_vm1, %v531_v23 }
 0x850   :  { %1270 = vmatpush3.msra.mxu0 %v1580_v5  ;;  %1277 = vmatprep.mubr.msk.f32.mxu0 %vm1514_vm0, %v1513_v0 }
 0x851   :  { %1271 = vmatprep.subr.mxu0 %v1513_v0 }
 0x852   :  { %1272 = vmatpush3.msra.mxu0 %v1582_v6 }
 0x853   :  { %1273 = vmatprep.subr.mxu0 %v1513_v0 }
 0x854   :  { %1274 = vmatpush3.msra.mxu0 %v1586_v8 }
 0x855   :  { %1275 = vmatprep.subr.mxu0 %v1513_v0 }
 0x856   :  { %1276 = vmatpush3.msra.mxu0 %v1590_v10 }
 0x857   :  { %1291 = vmatprep.subr.mxu0 %v1513_v0 }
 0x90f   :  { %v609_v25 = vpop.f32.mrf.mxu0 }
 0x910   :  { %v613_v26 = vadd.f32 %v609_v25, %v536_v24 }
 0x911   :  { %v1257_v27 = vpop.f32.mrf.mxu0 }
 0x912   :  { %1340 = vtanh.f32 %v613_v26  ;;  %v1143_v29 = vmul.f32 -1.442695, %v613_v26 }
 0x914   :  { %1342 = vpow2.f32 %v1143_v29 }
 0x91f   :  { %v1341_v28 = vpop.eup %1340 }
 0x920   :  { %623 = vrot.lane.b32.xlu1 %v1341_v28, %s1515_s22 }
 0x921   :  { %v1343_v30 = vpop.eup %1342 }
 0x922   :  { %v617_v31 = vadd.f32 1.0, %v1343_v30 }
 0x924   :  { %1344 = vrcp.f32 %v617_v31 }
 0x931   :  { %v1345_v32 = vpop.eup %1344 }
 0x932   :  { %v621_v35 = vmul.f32 %v1345_v32, %v522_v19 }
 0x992   :  { %v624_v33 = vpop.permute.xlu1 %623 }
 0x993   :  { %v626_v34 = vmul.f32 %v1345_v32, %v624_v33 }
 0x995   :  { %628 = vrot.lane.b32.xlu0 %v626_v34, %s1516_s24 }
 0xa07   :  { %v629_v36 = vpop.permute.xlu0 %628 }
 0xa08   :  { %v631_v37 = vadd.f32 %v629_v36, %v621_v35 }
 0xa0a   :  { %1346 = vtanh.f32 %v631_v37 }
 0xa17   :  { %v1347_v38 = vpop.eup %1346 }
 0xa18   :  { %634 = vrot.lane.b32.xlu1 %v1347_v38, %s1515_s22 }
 0xa8a   :  { %v635_v39 = vpop.permute.xlu1 %634 }
 0xa8b   :  { %v637_v40 = vmul.f32 %v1345_v32, %v635_v39  ;;  %v972_v32 = vld [vmem:[#allocation2 + $0x1c] sm:$0xf] }
 0xa8d   :  { %639 = vrot.lane.b32.xlu0 %v637_v40, %s1516_s24 }
 0xaff   :  { %v640_v41 = vpop.permute.xlu0 %639 }
 0xb00   :  { %643 = vst.msk [vmem:[#allocation9 + $0xc] sm:$0xf] %vm315_vm2, %v640_v41  ;;  %1267 = vmatmul.mubr.msk.f32.vlgmr.msra.gmra.mxu1 %vm84_vm1, %v640_v41 }
 0xb01   :  { %1281 = vmatpush3.msra.mxu1 %v1580_v5  ;;  %1288 = vmatprep.mubr.msk.f32.mxu1 %vm1514_vm0, %v1513_v0 }
 0xb02   :  { %1282 = vmatprep.subr.mxu1 %v1513_v0 }
 0xb03   :  { %1283 = vmatpush3.msra.mxu1 %v1582_v6 }
 0xb04   :  { %1284 = vmatprep.subr.mxu1 %v1513_v0 }
 0xb05   :  { %1285 = vmatpush3.msra.mxu1 %v1586_v8 }
 0xb06   :  { %1286 = vmatprep.subr.mxu1 %v1513_v0 }
 0xb07   :  { %1287 = vmatpush3.msra.mxu1 %v1590_v10 }
 0xbc0   :  { %v718_v43 = vpop.f32.mrf.mxu1 }
 0xbc1   :  { %v722_v44 = vadd.f32 %v718_v43, %v645_v42 }
 0xbc2   :  { %v1268_v45 = vpop.f32.mrf.mxu1 }
 0xbc3   :  { %1348 = vtanh.f32 %v722_v44  ;;  %v1145_v47 = vmul.f32 -1.442695, %v722_v44 }
 0xbc5   :  { %1350 = vpow2.f32 %v1145_v47 }
 0xbd0   :  { %v1349_v46 = vpop.eup %1348 }
 0xbd1   :  { %732 = vrot.lane.b32.xlu1 %v1349_v46, %s1515_s22 }
 0xbd2   :  { %v1351_v48 = vpop.eup %1350 }
 0xbd3   :  { %v726_v49 = vadd.f32 1.0, %v1351_v48 }
 0xbd5   :  { %1352 = vrcp.f32 %v726_v49 }
 0xbe2   :  { %v1353_v50 = vpop.eup %1352 }
 0xbe3   :  { %v730_v53 = vmul.f32 %v1353_v50, %v631_v37 }
 0xc43   :  { %v733_v51 = vpop.permute.xlu1 %732 }
 0xc44   :  { %v735_v52 = vmul.f32 %v1353_v50, %v733_v51 }
 0xc46   :  { %737 = vrot.lane.b32.xlu0 %v735_v52, %s1516_s24 }
 0xcb8   :  { %v738_v54 = vpop.permute.xlu0 %737 }
 0xcb9   :  { %v740_v55 = vadd.f32 %v738_v54, %v730_v53 }
 0xcbb   :  { %1354 = vtanh.f32 %v740_v55 }
 0xcc8   :  { %v1355_v56 = vpop.eup %1354 }
 0xcc9   :  { %743 = vrot.lane.b32.xlu1 %v1355_v56, %s1515_s22 }
 0xd3b   :  { %v744_v57 = vpop.permute.xlu1 %743 }
 0xd3c   :  { %v746_v58 = vmul.f32 %v1353_v50, %v744_v57 }
 0xd3e   :  { %748 = vrot.lane.b32.xlu0 %v746_v58, %s1516_s24 }
 0xdb0   :  { %v749_v59 = vpop.permute.xlu0 %748 }
 0xdb1   :  { %752 = vst.msk [vmem:[#allocation9 + $0x10] sm:$0xf] %vm315_vm2, %v749_v59  ;;  %1278 = vmatmul.mubr.msk.f32.vlgmr.msra.gmra.mxu0 %vm84_vm1, %v749_v59 }
 0xdb2   :  { %1292 = vmatpush3.msra.mxu0 %v1580_v5  ;;  %1299 = vmatprep.mubr.msk.f32.mxu0 %vm1514_vm0, %v1513_v0 }
 0xdb3   :  { %1293 = vmatprep.subr.mxu0 %v1513_v0 }
 0xdb4   :  { %1294 = vmatpush3.msra.mxu0 %v1582_v6 }
 0xdb5   :  { %1295 = vmatprep.subr.mxu0 %v1513_v0 }
 0xdb6   :  { %1296 = vmatpush3.msra.mxu0 %v1586_v8 }
 0xdb7   :  { %1297 = vmatprep.subr.mxu0 %v1513_v0 }
 0xdb8   :  { %1298 = vmatpush3.msra.mxu0 %v1590_v10 }
 0xe71   :  { %v827_v61 = vpop.f32.mrf.mxu0 }
 0xe72   :  { %v831_v62 = vadd.f32 %v827_v61, %v754_v60 }
 0xe73   :  { %v1279_v63 = vpop.f32.mrf.mxu0 }
 0xe74   :  { %1356 = vtanh.f32 %v831_v62  ;;  %v1147_v1 = vmul.f32 -1.442695, %v831_v62 }
 0xe76   :  { %1358 = vpow2.f32 %v1147_v1 }
 0xe81   :  { %v1357_v5 = vpop.eup %1356 }
 0xe82   :  { %841 = vrot.lane.b32.xlu1 %v1357_v5, %s1515_s22 }
 0xe83   :  { %v1359_v2 = vpop.eup %1358 }
 0xe84   :  { %v835_v6 = vadd.f32 1.0, %v1359_v2 }
 0xe86   :  { %1360 = vrcp.f32 %v835_v6 }
 0xe93   :  { %v1361_v3 = vpop.eup %1360 }
 0xe94   :  { %v839_v0 = vmul.f32 %v1361_v3, %v740_v55 }
 0xef4   :  { %v842_v4 = vpop.permute.xlu1 %841 }
 0xef5   :  { %v844_v8 = vmul.f32 %v1361_v3, %v842_v4 }
 0xef7   :  { %846 = vrot.lane.b32.xlu0 %v844_v8, %s1516_s24 }
 0xf69   :  { %v847_v10 = vpop.permute.xlu0 %846 }
 0xf6a   :  { %v849_v7 = vadd.f32 %v847_v10, %v839_v0 }
 0xf6c   :  { %1362 = vtanh.f32 %v849_v7 }
 0xf79   :  { %v1363_v9 = vpop.eup %1362 }
 0xf7a   :  { %852 = vrot.lane.b32.xlu1 %v1363_v9, %s1515_s22 }
 0xfec   :  { %v853_v11 = vpop.permute.xlu1 %852 }
 0xfed   :  { %v855_v12 = vmul.f32 %v1361_v3, %v853_v11 }
 0xfef   :  { %857 = vrot.lane.b32.xlu0 %v855_v12, %s1516_s24 }
0x1061   :  { %v858_v13 = vpop.permute.xlu0 %857 }
0x1062   :  { %861 = vst.msk [vmem:[#allocation9 + $0x14] sm:$0xf] %vm315_vm2, %v858_v13  ;;  %1289 = vmatmul.mubr.msk.f32.vlgmr.msra.gmra.mxu1 %vm84_vm1, %v858_v13 }
0x1122   :  { %v936_v15 = vpop.f32.mrf.mxu1 }
0x1123   :  { %v940_v16 = vadd.f32 %v936_v15, %v863_v14 }
0x1124   :  { %v1290_v17 = vpop.f32.mrf.mxu1 }
0x1125   :  { %1364 = vtanh.f32 %v940_v16  ;;  %v1149_v19 = vmul.f32 -1.442695, %v940_v16 }
0x1127   :  { %1366 = vpow2.f32 %v1149_v19 }
0x1132   :  { %v1365_v18 = vpop.eup %1364 }
0x1133   :  { %950 = vrot.lane.b32.xlu1 %v1365_v18, %s1515_s22 }
0x1134   :  { %v1367_v20 = vpop.eup %1366 }
0x1135   :  { %v944_v21 = vadd.f32 1.0, %v1367_v20 }
0x1137   :  { %1368 = vrcp.f32 %v944_v21 }
0x1144   :  { %v1369_v22 = vpop.eup %1368 }
0x1145   :  { %v948_v25 = vmul.f32 %v1369_v22, %v849_v7 }
0x11a5   :  { %v951_v23 = vpop.permute.xlu1 %950 }
0x11a6   :  { %v953_v24 = vmul.f32 %v1369_v22, %v951_v23 }
0x11a8   :  { %955 = vrot.lane.b32.xlu0 %v953_v24, %s1516_s24 }
0x121a   :  { %v956_v26 = vpop.permute.xlu0 %955 }
0x121b   :  { %v958_v27 = vadd.f32 %v956_v26, %v948_v25 }
0x121d   :  { %1370 = vtanh.f32 %v958_v27 }
0x122a   :  { %v1371_v28 = vpop.eup %1370 }
0x122b   :  { %961 = vrot.lane.b32.xlu1 %v1371_v28, %s1515_s22 }
0x129d   :  { %v962_v29 = vpop.permute.xlu1 %961 }
0x129e   :  { %v964_v30 = vmul.f32 %v1369_v22, %v962_v29 }
0x12a0   :  { %966 = vrot.lane.b32.xlu0 %v964_v30, %s1516_s24 }
0x1312   :  { %v967_v31 = vpop.permute.xlu0 %966 }
0x1313   :  { %970 = vst.msk [vmem:[#allocation9 + $0x18] sm:$0xf] %vm315_vm2, %v967_v31  ;;  %1300 = vmatmul.mubr.msk.f32.vlgmr.msra.gmra.mxu0 %vm84_vm1, %v967_v31 }
0x13d3   :  { %v1045_v33 = vpop.f32.mrf.mxu0 }
0x13d4   :  { %v1049_v34 = vadd.f32 %v1045_v33, %v972_v32 }
0x13d5   :  { %v1301_v35 = vpop.f32.mrf.mxu0 }
0x13d6   :  { %1372 = vtanh.f32 %v1049_v34  ;;  %v1151_v37 = vmul.f32 -1.442695, %v1049_v34 }
0x13d8   :  { %1374 = vpow2.f32 %v1151_v37 }
0x13e3   :  { %v1373_v36 = vpop.eup %1372 }
0x13e4   :  { %1059 = vrot.lane.b32.xlu1 %v1373_v36, %s1515_s22 }
0x13e5   :  { %v1375_v38 = vpop.eup %1374 }
0x13e6   :  { %v1053_v39 = vadd.f32 1.0, %v1375_v38 }
0x13e8   :  { %1376 = vrcp.f32 %v1053_v39 }
0x13f5   :  { %v1377_v40 = vpop.eup %1376 }
0x13f6   :  { %v1057_v43 = vmul.f32 %v1377_v40, %v958_v27 }
0x1456   :  { %v1060_v41 = vpop.permute.xlu1 %1059 }
0x1457   :  { %v1062_v42 = vmul.f32 %v1377_v40, %v1060_v41 }
0x1459   :  { %1064 = vrot.lane.b32.xlu0 %v1062_v42, %s1516_s24 }
0x14cb   :  { %v1065_v44 = vpop.permute.xlu0 %1064 }
0x14cc   :  { %v1067_v45 = vadd.f32 %v1065_v44, %v1057_v43 }
0x14ce   :  { %1378 = vtanh.f32 %v1067_v45 }
0x14db   :  { %v1379_v46 = vpop.eup %1378 }
0x14dc   :  { %1070 = vrot.lane.b32.xlu1 %v1379_v46, %s1515_s22 }
0x14e0   :  { %1082 = vrot.lane.b32.xlu1 %v1067_v45, %s1517_s5 }
0x154e   :  { %v1071_v47 = vpop.permute.xlu1 %1070 }
0x154f   :  { %v1073_v48 = vmul.f32 %v1377_v40, %v1071_v47 }
0x1551   :  { %1075 = vrot.lane.b32.xlu0 %v1073_v48, %s1516_s24 }
0x1552   :  { %v1083_v49 = vpop.permute.xlu1 %1082 }
0x1553   :  { %1085 = vst.msk [vmem:[#allocation12] sm:$0xf] %vm315_vm2, %v1083_v49 }
0x15c3   :  { %v1076_v50 = vpop.permute.xlu0 %1075 }
0x15c4   :  { %1079 = vst.msk [vmem:[#allocation9 + $0x1c] sm:$0xf] %vm315_vm2, %v1076_v50  ;;  %1080 = vst.msk [vmem:[#allocation10] sm:$0xf] %vm315_vm2, %v1076_v50 }
0x15c5   :  { %1451 = shalt.err (!%p1448_p5)
}
0x15c6   :  { %1107 = dma.vmem_to_hbm [thread:$0]  %s1105_s26, 64, %s1746_s7, [#allocation11]  }
0x15c7   :  { %s1460_s12 = scalar_lea.vmem %s1092_s28, 512  ;;  %p1465_p7 = scmp.lt.s32.totalorder %s1092_s28, %s1092_s28 }
0x15c8   :  { %p1461_p6 = scmp.ne.s32.totalorder %s1092_s28, %s1460_s12  ;;  %p1466_p8 = scmp.lt.s32.totalorder %s1460_s12, %s1460_s12 }
0x15ca   :  { %p1467_p9 = por %p1466_p8, %p1465_p7 }
0x15cc   :  { %p1468_p10 = pnand %p1467_p9, %p1461_p6 }
0x15ce   :  { %1471 = shalt.err (!%p1468_p10)
}
0x15cf   :  { %s1521_s13 = smov 4   ;;  %s1480_s16 = scalar_lea.vmem %s1115_s30, 64 }
0x15d0   :  { %1097 = dma.vmem_to_hbm [thread:$0]  %s1092_s28, 512, %s1745_s6, [#allocation5], %s1515_s22, %s1515_s22, %s1521_s13  }
0x15d1   :  { %p1481_p11 = scmp.ne.s32.totalorder %s1115_s30, %s1480_s16  ;;  %p1485_p12 = scmp.lt.s32.totalorder %s1115_s30, %s1115_s30 }
0x15d2   :  { %p1486_p13 = scmp.lt.s32.totalorder %s1480_s16, %s1480_s16 }
0x15d4   :  { %p1487_p0 = por %p1486_p13, %p1485_p12 }
0x15d6   :  { %p1488_p1 = pnand %p1487_p0, %p1481_p11 }
0x15d8   :  { %1491 = shalt.err (!%p1488_p1)
}
0x15d9   :  { %1117 = dma.vmem_to_hbm [thread:$0]  %s1115_s30, 64, %s1747_s8, [#allocation11]  }
0x15da   :  { %1504 = dma.done.wait [#allocation5], 512  }
0x15db   :  { %1505 = vsyncadd [#allocation5], 4294966784 }
0x15dc   :  { %1506 = dma.done.wait [#allocation11], 128  }
0x15dd   :  { %1507 = vsyncadd [#allocation11], 4294967168 }
0x15de   :  { %1127 = vsyncpa [#allocation4], 1 }
0x15df   :  { %1128 = vsyncpa [#allocation7], 1 }
0x15e0   :  { %1129 = vsyncpa [#allocation5], 1 }
0x15e1   :  { %1130 = vsyncpa [#allocation11], 1 }

</bundles_post_ra>
